<compile_context>
chip_gen: v7x
topology: tpu7x:2x2x1
jax: 0.10.0
libtpu: 0.0.40
codegen_flags: <defaults>
</compile_context>

<pallas_src>
import math

import jax
import jax.numpy as jnp
from jax.experimental import pallas as pl
from jax.experimental.pallas import tpu as pltpu


def _pick_rows_per_tile(h, w, c, itemsize, batch):
    """Whole input rows per grid step (tiles never straddle an image row).

    Legality: ts = th*W must be a legal minor block (multiple of 128 or the
    full extent) and th must divide H.
    Performance: keep double-buffered x+out tiles <= ~12 MiB so depth-2
    pipelining fits every generation's scoped VMEM (v7x: 64 MiB physical,
    32 MiB default), keep the in-kernel unroll modest, and keep >= 2 grid
    steps when batch == 1 so both v7x TensorCores get work.
    """
    legal = [th for th in range(1, h + 1)
             if h % th == 0 and ((th * w) % 128 == 0 or th == h)]
    budget = 12 << 20  # bytes for the double-buffered x + out blocks
    good = [th for th in legal
            if 10 * c * th * w * itemsize <= budget and th <= 32]
    # Fallback: smallest legal tile (VMEM-safe) if nothing fits the budget.
    cands = good if good else [min(legal)]
    if batch == 1:
        split = [th for th in cands if th < h]
        if split:
            cands = split
    return max(cands)


def _interleave_matrix(w, g, dtype):
    """Block-diagonal 0/1 matrix (g*W, 2*g*W): row p -> columns 2*(p%W)+dw of
    block p//W.  Applied to g packed rows it produces the width-interleaved
    (dw) layout of nearest upsampling.  Exact in any dtype (values are 0/1)."""
    p = jnp.arange(g * w)
    q = jnp.arange(2 * g * w)
    same_blk = (p[:, None] // w) == (q[None, :] // (2 * w))
    same_col = (p[:, None] % w) == ((q[None, :] % (2 * w)) // 2)
    return (same_blk & same_col).astype(dtype)


def _make_kernel(ch, th, w, ts, g, r_via_dma):
    gw = g * w
    n_groups = th // g

    def kernel(x_ref, w_ref, b_ref, rep_ref, r_ref, o_ref, y_scr, *maybe_sem):
        # x_ref:   (1, C, TS)        original-resolution tile, spatial flattened
        # w_ref:   (Ch, C)           1x1 conv weight
        # b_ref:   (Ch, 1)           bias (f32)
        # rep_ref: (g*W, 2*g*W)      0/1 width-interleave matrix
        # r_ref:   HBM ref (N,Ch,4S) if r_via_dma else VMEM block (1, Ch, 4*TS)
        # o_ref:   (1, C, 4*TS)      output tile (channels [0:Ch]=conv, [Ch:]=r)
        # y_scr:   (Ch, TS)          VMEM scratch for the conv result
        if r_via_dma:
            # Skip connection: HBM -> output VMEM block on the copy engine.
            # No vreg round trip; overlapped with the conv/upsample below.
            n = pl.program_id(0)
            i = pl.program_id(1)
            copy_sem, = maybe_sem
            r_copy = pltpu.make_async_copy(
                r_ref.at[n, :, pl.ds(i * 4 * ts, 4 * ts)],
                o_ref.at[0, pl.ds(ch, ch), :],
                copy_sem,
            )
            r_copy.start()

        # 1x1 conv commutes with nearest upsampling -> run it once on the
        # original-resolution tile (4x less MXU work, MXU fed with N = TS).
        acc = jnp.dot(w_ref[...], x_ref[0], preferred_element_type=jnp.float32)
        y_scr[...] = (acc + b_ref[...]).astype(y_scr.dtype)        # (Ch, TS)

        # Nearest 2x upsample, g input rows per step:
        #   width  (dw): tiny exact 0/1 matmul (g*W, 2*g*W), g*W ~ 128
        #   height (dh): the two half-rows are identical and adjacent in the
        #                flat (h, dh, w, dw) layout -> duplicate with a concat.
        for t in range(n_groups):
            q = y_scr[:, t * gw:(t + 1) * gw]                      # (Ch, g*W)
            z = jnp.dot(q, rep_ref[...],
                        preferred_element_type=jnp.float32).astype(o_ref.dtype)
            pieces = []
            for j in range(g):
                zr = z[:, j * 2 * w:(j + 1) * 2 * w]               # (Ch, 2W)
                pieces += [zr, zr]                                 # dh = 0, 1
            o_ref[0, :ch, t * 4 * gw:(t + 1) * 4 * gw] = jnp.concatenate(
                pieces, axis=-1)

        if r_via_dma:
            r_copy.wait()
        else:
            o_ref[0, ch:, :] = r_ref[0].astype(o_ref.dtype)

    return kernel


def upsampling_forward(x, r, weight, bias):
    """UpSampling.forward(x, r) in NCHW.

    x: (N, C, H, W); r: (N, C//2, 2H, 2W)
    weight: (C//2, C) (Conv2d 1x1 weight squeezed); bias: (C//2,)
    returns: (N, C, 2H, 2W), dtype of x.
    """
    n, c, h, w = x.shape
    assert c % 2 == 0, "Conv2d(C, C // 2) needs an even channel count"
    ch = c // 2
    assert r.shape == (n, ch, 2 * h, 2 * w)
    out_dtype = x.dtype
    itemsize = jnp.dtype(out_dtype).itemsize
    s = h * w

    th = _pick_rows_per_tile(h, w, c, itemsize, n)   # input rows per grid step
    ts = th * w                                      # flat spatial tile
    n_t = s // ts
    g = math.gcd(th, max(1, 128 // w))               # rows per upsample matmul

    # Sublane-aligned DMA window for the skip connection; tiny-channel cases
    # (ch % 8 != 0, only toy shapes) fall back to a plain vector copy.
    r_via_dma = (ch % 8 == 0)

    # Free, contiguous reshapes only; no transposes, no upsampled x in HBM.
    x_flat = x.reshape(n, c, s)
    r_flat = r.astype(out_dtype).reshape(n, ch, 4 * s)
    # Weights follow the activation dtype on purpose: bf16 activations give
    # bf16 MXU feeds with f32 accumulation; f32 activations stay exact f32.
    w_mat = weight.astype(out_dtype)                 # (Ch, C)
    b_mat = bias.astype(jnp.float32).reshape(ch, 1)  # f32 accumulate
    rep = _interleave_matrix(w, g, out_dtype)        # (g*W, 2*g*W), exact 0/1

    # Explicit scoped-VMEM limit (v5e defaults to 16 MiB): double-buffered
    # x/out tiles + constants + scratch, clamped to stay sane on v7x.
    tile_bytes = 2 * (c * ts + c * 4 * ts) * itemsize
    const_bytes = (2 * ch * c + 2 * (g * w) * (2 * g * w) + ch * ts) * itemsize + ch * 8
    vmem_limit = int(min(max(32 << 20, tile_bytes + const_bytes + (4 << 20)),
                         100 << 20))

    in_specs = [
        pl.BlockSpec((1, c, ts), lambda b, i: (b, 0, i)),          # x tile
        pl.BlockSpec((ch, c), lambda b, i: (0, 0)),                # weight
        pl.BlockSpec((ch, 1), lambda b, i: (0, 0)),                # bias
        pl.BlockSpec((g * w, 2 * g * w), lambda b, i: (0, 0)),     # interleave
    ]
    if r_via_dma:
        in_specs.append(pl.BlockSpec(memory_space=pl.ANY))         # r stays in HBM
    else:
        in_specs.append(pl.BlockSpec((1, ch, 4 * ts), lambda b, i: (b, 0, i)))

    scratch_shapes = [pltpu.VMEM((ch, ts), out_dtype)]             # conv result
    if r_via_dma:
        scratch_shapes.append(pltpu.SemaphoreType.DMA)             # r-copy sem

    kernel = _make_kernel(ch, th, w, ts, g, r_via_dma)
    out_flat = pl.pallas_call(
        kernel,
        out_shape=jax.ShapeDtypeStruct((n, c, 4 * s), out_dtype),
        grid_spec=pltpu.PrefetchScalarGridSpec(
            num_scalar_prefetch=0,
            grid=(n, n_t),
            in_specs=in_specs,
            out_specs=pl.BlockSpec((1, c, 4 * ts), lambda b, i: (b, 0, i)),
            scratch_shapes=scratch_shapes,
        ),
        compiler_params=pltpu.CompilerParams(
            dimension_semantics=("parallel", "parallel"),
            vmem_limit_bytes=vmem_limit,
        ),
    )(x_flat, w_mat, b_mat, rep, r_flat)

    return out_flat.reshape(n, c, 2 * h, 2 * w)


def _reference(x, r, weight, bias):
    # Pure-JAX reference matching the PyTorch module semantics.
    up = jnp.repeat(jnp.repeat(x, 2, axis=2), 2, axis=3)
    y = jnp.einsum("nchw,oc->nohw", up, weight,
                   precision=jax.lax.Precision.HIGHEST)
    y = y + bias[None, :, None, None]
    return jnp.concatenate([y.astype(x.dtype), r.astype(x.dtype)], axis=1)


if __name__ == "__main__":
    key = jax.random.PRNGKey(0)
    k_x, k_r, k_w, k_b = jax.random.split(key, 4)

    N, C, H, W = 2, 16, 16, 16          # small shapes consistent with the module
    Ch = C // 2

    x = jax.random.normal(k_x, (N, C, H, W), dtype=jnp.float32)
    r = jax.random.normal(k_r, (N, Ch, 2 * H, 2 * W), dtype=jnp.float32)

    # Deterministic Conv2d(C, C//2, 1, 1) parameters (weight squeezed to 2-D).
    weight = jax.random.normal(k_w, (Ch, C), dtype=jnp.float32) * 0.1
    bias = jax.random.normal(k_b, (Ch,), dtype=jnp.float32) * 0.1

    out = jax.jit(upsampling_forward)(x, r, weight, bias)
    out = jax.block_until_ready(out)

    ref = _reference(x, r, weight, bias)
    assert out.shape == (N, C, 2 * H, 2 * W)
    err = float(jnp.max(jnp.abs(out - ref)))
    assert jnp.allclose(out, ref, atol=2e-5, rtol=2e-5), err

    print("KERNEL_OK")
</pallas_src>

<mosaic_0001>
module attributes {stable_mosaic.version = 11 : i64} {
  func.func @kernel(%arg0: i32, %arg1: i32, %arg2: memref<1x16x256xf32, #tpu.memory_space<vmem>>, %arg3: memref<8x16xf32, #tpu.memory_space<vmem>>, %arg4: memref<8x1xf32, #tpu.memory_space<vmem>>, %arg5: memref<128x256xf32, #tpu.memory_space<vmem>>, %arg6: memref<2x8x1024xf32, #tpu.memory_space<any>>, %arg7: memref<1x16x1024xf32, #tpu.memory_space<vmem>>, %arg8: memref<8x256xf32, #tpu.memory_space<vmem>>, %arg9: memref<!tpu.dma_semaphore, #tpu.memory_space<semaphore_mem>>) attributes {dimension_semantics = [#tpu.dimension_semantics<parallel>, #tpu.dimension_semantics<parallel>], iteration_bounds = array<i64: 2, 1>, scalar_prefetch = 0 : i64, scratch_operands = 2 : i64, tpu.core_type = #tpu.core_type<tc>, window_params = [{transform_indices = @transform_0, window_bounds = array<i64: 1, 16, 256>}, {pipeline_mode = #tpu.pipeline_mode<synchronous>, transform_indices = @transform_1, window_bounds = array<i64: 8, 16>}, {pipeline_mode = #tpu.pipeline_mode<synchronous>, transform_indices = @transform_2, window_bounds = array<i64: 8, 1>}, {pipeline_mode = #tpu.pipeline_mode<synchronous>, transform_indices = @transform_3, window_bounds = array<i64: 128, 256>}, {}, {transform_indices = @transform_5, window_bounds = array<i64: 1, 16, 1024>}]} {
    %c4_i32 = arith.constant 4 : i32
    %0 = arith.muli %arg1, %c4_i32 : i32
    %c256_i32 = arith.constant 256 : i32
    %1 = arith.muli %0, %c256_i32 : i32
    %c0_i32 = arith.constant 0 : i32
    %c0_i32_0 = arith.constant 0 : i32
    %2 = tpu.memref_slice %arg6[%arg0, %c0_i32_0, %1] : memref<2x8x1024xf32, #tpu.memory_space<any>> -> memref<1x8x1024xf32, #tpu.memory_space<any>>
    %3 = tpu.memref_squeeze %2 : memref<1x8x1024xf32, #tpu.memory_space<any>> -> memref<8x1024xf32, #tpu.memory_space<any>>
    %c8_i32 = arith.constant 8 : i32
    %c0_i32_1 = arith.constant 0 : i32
    %4 = tpu.memref_slice %arg7[%c0_i32, %c8_i32, %c0_i32_1] : memref<1x16x1024xf32, #tpu.memory_space<vmem>> -> memref<1x8x1024xf32, #tpu.memory_space<vmem>>
    %5 = tpu.memref_squeeze %4 : memref<1x8x1024xf32, #tpu.memory_space<vmem>> -> memref<8x1024xf32, #tpu.memory_space<vmem>>
    tpu.enqueue_dma source(%3 : memref<8x1024xf32, #tpu.memory_space<any>>) target(%5 : memref<8x1024xf32, #tpu.memory_space<vmem>>) target_semaphore(%arg9 : memref<!tpu.dma_semaphore, #tpu.memory_space<semaphore_mem>>)
    %c0 = arith.constant 0 : index
    %c0_2 = arith.constant 0 : index
    %6 = vector.load %arg3[%c0, %c0_2] : memref<8x16xf32, #tpu.memory_space<vmem>>, vector<8x16xf32>
    %c0_3 = arith.constant 0 : index
    %c0_4 = arith.constant 0 : index
    %c0_5 = arith.constant 0 : index
    %7 = vector.load %arg2[%c0_3, %c0_4, %c0_5] : memref<1x16x256xf32, #tpu.memory_space<vmem>>, vector<1x16x256xf32>
    %8 = vector.shape_cast %7 : vector<1x16x256xf32> to vector<16x256xf32>
    %cst = arith.constant dense<0.000000e+00> : vector<8x256xf32>
    %9 = tpu.matmul %6, %8, %cst {dimension_numbers = #tpu.dot_dimension_numbers<[1], [0], [0], [1], [0, 0, 1, 1], [], []>} : vector<8x16xf32>, vector<16x256xf32>, vector<8x256xf32> -> vector<8x256xf32>
    %c0_6 = arith.constant 0 : index
    %c0_7 = arith.constant 0 : index
    %10 = vector.load %arg4[%c0_6, %c0_7] : memref<8x1xf32, #tpu.memory_space<vmem>>, vector<8x1xf32>
    %11 = vector.broadcast %10 : vector<8x1xf32> to vector<8x256xf32>
    %12 = arith.addf %9, %11 : vector<8x256xf32>
    %c0_8 = arith.constant 0 : index
    %c0_9 = arith.constant 0 : index
    %13 = vector.load %arg8[%c0_8, %c0_9] : memref<8x256xf32, #tpu.memory_space<vmem>>, vector<8x256xf32>
    tpu.vector_store %arg8[%c0_8, %c0_9], %12 {strides = array<i32>} : memref<8x256xf32, #tpu.memory_space<vmem>>, vector<8x256xf32>,
    %c0_10 = arith.constant 0 : index
    %c0_11 = arith.constant 0 : index
    %14 = vector.load %arg8[%c0_10, %c0_11] : memref<8x256xf32, #tpu.memory_space<vmem>>, vector<8x128xf32>
    %c0_12 = arith.constant 0 : index
    %c0_13 = arith.constant 0 : index
    %15 = vector.load %arg5[%c0_12, %c0_13] : memref<128x256xf32, #tpu.memory_space<vmem>>, vector<128x256xf32>
    %cst_14 = arith.constant dense<0.000000e+00> : vector<8x256xf32>
    %16 = tpu.matmul %14, %15, %cst_14 {dimension_numbers = #tpu.dot_dimension_numbers<[1], [0], [0], [1], [0, 0, 1, 1], [], []>} : vector<8x128xf32>, vector<128x256xf32>, vector<8x256xf32> -> vector<8x256xf32>
    %17 = vector.extract_strided_slice %16 {offsets = [0, 0], sizes = [8, 32], strides = [1, 1]} : vector<8x256xf32> to vector<8x32xf32>
    %18 = vector.extract_strided_slice %16 {offsets = [0, 32], sizes = [8, 32], strides = [1, 1]} : vector<8x256xf32> to vector<8x32xf32>
    %19 = vector.extract_strided_slice %16 {offsets = [0, 64], sizes = [8, 32], strides = [1, 1]} : vector<8x256xf32> to vector<8x32xf32>
    %20 = vector.extract_strided_slice %16 {offsets = [0, 96], sizes = [8, 32], strides = [1, 1]} : vector<8x256xf32> to vector<8x32xf32>
    %21 = vector.extract_strided_slice %16 {offsets = [0, 128], sizes = [8, 32], strides = [1, 1]} : vector<8x256xf32> to vector<8x32xf32>
    %22 = vector.extract_strided_slice %16 {offsets = [0, 160], sizes = [8, 32], strides = [1, 1]} : vector<8x256xf32> to vector<8x32xf32>
    %23 = vector.extract_strided_slice %16 {offsets = [0, 192], sizes = [8, 32], strides = [1, 1]} : vector<8x256xf32> to vector<8x32xf32>
    %24 = vector.extract_strided_slice %16 {offsets = [0, 224], sizes = [8, 32], strides = [1, 1]} : vector<8x256xf32> to vector<8x32xf32>
    %25 = tpu.concatenate %17, %17, %18, %18, %19, %19, %20, %20, %21, %21, %22, %22, %23, %23, %24, %24 in 1 : vector<8x32xf32>, vector<8x32xf32>, vector<8x32xf32>, vector<8x32xf32>, vector<8x32xf32>, vector<8x32xf32>, vector<8x32xf32>, vector<8x32xf32>, vector<8x32xf32>, vector<8x32xf32>, vector<8x32xf32>, vector<8x32xf32>, vector<8x32xf32>, vector<8x32xf32>, vector<8x32xf32>, vector<8x32xf32> -> vector<8x512xf32>
    %c0_15 = arith.constant 0 : index
    %c0_16 = arith.constant 0 : index
    %c0_17 = arith.constant 0 : index
    %26 = vector.load %arg7[%c0_15, %c0_16, %c0_17] : memref<1x16x1024xf32, #tpu.memory_space<vmem>>, vector<1x8x512xf32>
    %27 = vector.shape_cast %26 : vector<1x8x512xf32> to vector<8x512xf32>
    %28 = vector.shape_cast %25 : vector<8x512xf32> to vector<1x8x512xf32>
    tpu.vector_store %arg7[%c0_15, %c0_16, %c0_17], %28 {strides = array<i32>} : memref<1x16x1024xf32, #tpu.memory_space<vmem>>, vector<1x8x512xf32>,
    %c0_18 = arith.constant 0 : index
    %c128 = arith.constant 128 : index
    %29 = vector.load %arg8[%c0_18, %c128] : memref<8x256xf32, #tpu.memory_space<vmem>>, vector<8x128xf32>
    %c0_19 = arith.constant 0 : index
    %c0_20 = arith.constant 0 : index
    %30 = vector.load %arg5[%c0_19, %c0_20] : memref<128x256xf32, #tpu.memory_space<vmem>>, vector<128x256xf32>
    %cst_21 = arith.constant dense<0.000000e+00> : vector<8x256xf32>
    %31 = tpu.matmul %29, %30, %cst_21 {dimension_numbers = #tpu.dot_dimension_numbers<[1], [0], [0], [1], [0, 0, 1, 1], [], []>} : vector<8x128xf32>, vector<128x256xf32>, vector<8x256xf32> -> vector<8x256xf32>
    %32 = vector.extract_strided_slice %31 {offsets = [0, 0], sizes = [8, 32], strides = [1, 1]} : vector<8x256xf32> to vector<8x32xf32>
    %33 = vector.extract_strided_slice %31 {offsets = [0, 32], sizes = [8, 32], strides = [1, 1]} : vector<8x256xf32> to vector<8x32xf32>
    %34 = vector.extract_strided_slice %31 {offsets = [0, 64], sizes = [8, 32], strides = [1, 1]} : vector<8x256xf32> to vector<8x32xf32>
    %35 = vector.extract_strided_slice %31 {offsets = [0, 96], sizes = [8, 32], strides = [1, 1]} : vector<8x256xf32> to vector<8x32xf32>
    %36 = vector.extract_strided_slice %31 {offsets = [0, 128], sizes = [8, 32], strides = [1, 1]} : vector<8x256xf32> to vector<8x32xf32>
    %37 = vector.extract_strided_slice %31 {offsets = [0, 160], sizes = [8, 32], strides = [1, 1]} : vector<8x256xf32> to vector<8x32xf32>
    %38 = vector.extract_strided_slice %31 {offsets = [0, 192], sizes = [8, 32], strides = [1, 1]} : vector<8x256xf32> to vector<8x32xf32>
    %39 = vector.extract_strided_slice %31 {offsets = [0, 224], sizes = [8, 32], strides = [1, 1]} : vector<8x256xf32> to vector<8x32xf32>
    %40 = tpu.concatenate %32, %32, %33, %33, %34, %34, %35, %35, %36, %36, %37, %37, %38, %38, %39, %39 in 1 : vector<8x32xf32>, vector<8x32xf32>, vector<8x32xf32>, vector<8x32xf32>, vector<8x32xf32>, vector<8x32xf32>, vector<8x32xf32>, vector<8x32xf32>, vector<8x32xf32>, vector<8x32xf32>, vector<8x32xf32>, vector<8x32xf32>, vector<8x32xf32>, vector<8x32xf32>, vector<8x32xf32>, vector<8x32xf32> -> vector<8x512xf32>
    %c0_22 = arith.constant 0 : index
    %c0_23 = arith.constant 0 : index
    %c512 = arith.constant 512 : index
    %41 = vector.load %arg7[%c0_22, %c0_23, %c512] : memref<1x16x1024xf32, #tpu.memory_space<vmem>>, vector<1x8x512xf32>
    %42 = vector.shape_cast %41 : vector<1x8x512xf32> to vector<8x512xf32>
    %43 = vector.shape_cast %40 : vector<8x512xf32> to vector<1x8x512xf32>
    tpu.vector_store %arg7[%c0_22, %c0_23, %c512], %43 {strides = array<i32>} : memref<1x16x1024xf32, #tpu.memory_space<vmem>>, vector<1x8x512xf32>,
    %c0_i32_24 = arith.constant 0 : i32
    %c0_i32_25 = arith.constant 0 : i32
    %44 = tpu.memref_slice %arg6[%arg0, %c0_i32_25, %1] : memref<2x8x1024xf32, #tpu.memory_space<any>> -> memref<1x8x1024xf32, #tpu.memory_space<any>>
    %45 = tpu.memref_squeeze %44 : memref<1x8x1024xf32, #tpu.memory_space<any>> -> memref<8x1024xf32, #tpu.memory_space<any>>
    %c8_i32_26 = arith.constant 8 : i32
    %c0_i32_27 = arith.constant 0 : i32
    %46 = tpu.memref_slice %arg7[%c0_i32_24, %c8_i32_26, %c0_i32_27] : memref<1x16x1024xf32, #tpu.memory_space<vmem>> -> memref<1x8x1024xf32, #tpu.memory_space<vmem>>
    %47 = tpu.memref_squeeze %46 : memref<1x8x1024xf32, #tpu.memory_space<vmem>> -> memref<8x1024xf32, #tpu.memory_space<vmem>>
    tpu.wait_dma2 semaphore(%arg9 : memref<!tpu.dma_semaphore, #tpu.memory_space<semaphore_mem>>) src(%45 : memref<8x1024xf32, #tpu.memory_space<any>>) dst(%47 : memref<8x1024xf32, #tpu.memory_space<vmem>>)
    return
  }
  func.func @transform_0(%arg0: i32, %arg1: i32) -> (i32, i32, i32) {
    %c0_i32 = arith.constant 0 : i32
    %c0_i32_0 = arith.constant 0 : i32
    return %arg0, %c0_i32, %arg1 : i32, i32, i32
  }
  func.func @transform_1(%arg0: i32, %arg1: i32) -> (i32, i32) {
    %c0_i32 = arith.constant 0 : i32
    %c0_i32_0 = arith.constant 0 : i32
    %c0_i32_1 = arith.constant 0 : i32
    return %c0_i32, %c0_i32_0 : i32, i32
  }
  func.func @transform_2(%arg0: i32, %arg1: i32) -> (i32, i32) {
    %c0_i32 = arith.constant 0 : i32
    %c0_i32_0 = arith.constant 0 : i32
    %c0_i32_1 = arith.constant 0 : i32
    return %c0_i32, %c0_i32_0 : i32, i32
  }
  func.func @transform_3(%arg0: i32, %arg1: i32) -> (i32, i32) {
    %c0_i32 = arith.constant 0 : i32
    %c0_i32_0 = arith.constant 0 : i32
    %c0_i32_1 = arith.constant 0 : i32
    return %c0_i32, %c0_i32_0 : i32, i32
  }
  func.func @transform_5(%arg0: i32, %arg1: i32) -> (i32, i32, i32) {
    %c0_i32 = arith.constant 0 : i32
    %c0_i32_0 = arith.constant 0 : i32
    return %arg0, %c0_i32, %arg1 : i32, i32, i32
  }
}

</mosaic_0001>

<bundles_post_ra>
// kernel: upsampling_forward.1
= control target key start
LH: loop header
LB: loop body
LE: loop exit
PB: predicated region body
PF: predicated region fallthrough
CT: control target
= control target key end

     0   :  { %s968_s18 = smov 0   ;;  %s970_s19 = smov 0   ;;  %s1148_s0 = inlined_call_operand.vmem [shape: f32[2,16,256], index: 0, kind: input, shape index: {}]   ;;  %s1149_s1 = inlined_call_operand.vmem [shape: f32[8,16], index: 1, kind: input, shape index: {}]   ;;  %s1150_s2 = inlined_call_operand.vmem [shape: f32[8,1], index: 2, kind: input, shape index: {}]   ;;  %s1151_s3 = inlined_call_operand.vmem [shape: f32[128,256], index: 3, kind: input, shape index: {}]   ;;  %s1152_s4 = inlined_call_operand.vmem [shape: f32[2,8,1024], index: 4, kind: input, shape index: {}]   ;;  %s1153_s5 = inlined_call_operand.vmem [shape: f32[2,16,1024], index: 5, kind: output, shape index: {}]  }
   0x1   :  { %s972_s20 = smov 0  }
   0x2 LB: > { %s27_s21 = sadd.s32 1, %s927_s19  ;;  %p786_p0 = scmp.ge.s32.totalorder %s931_s20, 1  ;;  %s931_s20 = sphi %s972_s20, %s15_s20   ;;  %s927_s19 = sphi %s970_s19, %s1155_s19   ;;  %s923_s18 = sphi %s968_s18, %s1154_s18  }
   0x3   : > { %p29_p1 = scmp.ge.s32.totalorder %s27_s21, 2  ;;  %p184_p2 = scmp.lt.s32.totalorder %s931_s20, 3 }
   0x5   : > { %s1157_s21 = smov (%p29_p1, %s27_s21), 0  ;;  %p185_p3 = pnand %p786_p0, %p184_p2 }
   0x6   : > { %p219_p4 = scmp.lt.s32.totalorder (!%p185_p3), %s923_s18, 1  ;;  %s808_s22 = sshll.u32 (!%p185_p3), %s923_s18, 6 }
   0x7   : > { %188 = sbr.rel (%p185_p3) target bundleno = 595 (0x253), region = 36  ;;  %s244_s25 = scalar_lea.vmem (!%p185_p3), %s1152_s4, %s808_s22 }
   0x8   : > { %v278_v0 = vld [vmem:[%s244_s25] sm:$0xff] (!%p185_p3)  ;;  %v280_v1 = vld [vmem:[%s244_s25 + $0x8] sm:$0xff] (!%p185_p3)  ;;  %v282_v2 = vld [vmem:[%s244_s25 + $0x10] sm:$0xff] (!%p185_p3) }
   0x9   : > { %v284_v3 = vld [vmem:[%s244_s25 + $0x18] sm:$0xff] (!%p185_p3)  ;;  %v286_v4 = vld [vmem:[%s244_s25 + $0x20] sm:$0xff] (!%p185_p3)  ;;  %v288_v5 = vld [vmem:[%s244_s25 + $0x28] sm:$0xff] (!%p185_p3) }
   0xa   : > { %v290_v6 = vld [vmem:[%s244_s25 + $0x30] sm:$0xff] (!%p185_p3)  ;;  %v292_v7 = vld [vmem:[%s244_s25 + $0x38] sm:$0xff] (!%p185_p3) }
   0xe   : > { %s1159_s18 = smov (!%p219_p4, %s923_s18), 1 }
   0xf   : > { %s806_s26 = sshll.u32 %s1159_s18, 5  ;;  %s807_s27 = sshll.u32 %s1159_s18, 7 }
  0x10   : > { %s226_s30 = scalar_lea.vmem %s1148_s0, %s806_s26  ;;  %s995_s8 = scalar_lea.vmem %s1153_s5, %s807_s27 }
  0x11   : > { %793 = vst [vmem:[%s995_s8 + $0x40] sm:$0xff] %v278_v0  ;;  %794 = vst [vmem:[%s995_s8 + $0x48] sm:$0xff] %v280_v1 }
  0x12   : > { %795 = vst [vmem:[%s995_s8 + $0x50] sm:$0xff] %v282_v2  ;;  %796 = vst [vmem:[%s995_s8 + $0x58] sm:$0xff] %v284_v3 }
  0x13   : > { %797 = vst [vmem:[%s995_s8 + $0x60] sm:$0xff] %v286_v4  ;;  %798 = vst [vmem:[%s995_s8 + $0x68] sm:$0xff] %v288_v5 }
  0x14   : > { %799 = vst [vmem:[%s995_s8 + $0x70] sm:$0xff] %v290_v6  ;;  %800 = vst [vmem:[%s995_s8 + $0x78] sm:$0xff] %v292_v7 }
  0x15   : > { %301 = vsyncadd [#allocation3], 1024  ;;  %v304_v8 = vld [vmem:[%s226_s30 + $0x8] sm:$0xff]  ;;  %v306_v9 = vld [vmem:[%s226_s30 + $0x18] sm:$0xff]  ;;  %v933_v13 = vmov 0.0   ;;  %v934_v16 = vmov 0  }
  0x16   : > { %v809_v10 = vpack.c.bf16 %v306_v9, %v304_v8  ;;  %v303_v11 = vld [vmem:[%s226_s30] sm:$0xff]  ;;  %v305_v12 = vld [vmem:[%s226_s30 + $0x10] sm:$0xff]  ;;  %381 = vmatprep.mubr.f32.mxu0 %v933_v13  ;;  %487 = vmatprep.mubr.f32.mxu1 %v933_v13  ;;  %v392_v18 = vld [vmem:[%s1151_s3 + $0x8] sm:$0xff]  ;;  %vm313_vm0 = vcmask 130048   ;;  %s935_s14 = smov 64   ;;  %s936_s15 = smov 32  }
  0x17   : > { %v811_v14 = vpack.c.bf16 %v305_v12, %v303_v11  ;;  %v302_v15 = vld [vmem:[%s1149_s1] sm:$0xff]  ;;  %906 = vset.pattern.permute.xlu0 %v934_v16  ;;  %v394_v19 = vld [vmem:[%s1151_s3 + $0x18] sm:$0xff]  ;;  %v393_v22 = vld [vmem:[%s1151_s3 + $0x10] sm:$0xff]  ;;  %s937_s16 = smov 96   ;;  %vm514_vm1 = vcmask 261120   ;;  %vm516_vm2 = vcmask 523264  }
  0x18   : > { %v307_v17 = vld [vmem:[%s1150_s2] sm:$0xff]  ;;  %810 = vmatprep.subr.bf16.mxu0 %v809_v10  ;;  %v813_v20 = vpack.c.bf16 %v394_v19, %v392_v18  ;;  %v396_v23 = vld [vmem:[%s1151_s3 + $0x28] sm:$0xff]  ;;  %v398_v25 = vld [vmem:[%s1151_s3 + $0x38] sm:$0xff]  ;;  %vm518_vm3 = vcmask 785408  }
  0x19   : > { %310 = vperm.xlu0 %906, %v307_v17   ;;  %v391_v21 = vld [vmem:[%s1151_s3] sm:$0xff]  ;;  %812 = vmatpush1.bf16.msra.mxu0 %v811_v14  ;;  %v397_v27 = vld [vmem:[%s1151_s3 + $0x30] sm:$0xff]  ;;  %v817_v28 = vpack.c.bf16 %v398_v25, %v396_v23  ;;  %v400_v29 = vld [vmem:[%s1151_s3 + $0x48] sm:$0xff] }
  0x1a   : > { %v815_v24 = vpack.c.bf16 %v393_v22, %v391_v21  ;;  %v395_v26 = vld [vmem:[%s1151_s3 + $0x20] sm:$0xff]  ;;  %814 = vmatprep.subr.bf16.mxu1 %v813_v20  ;;  %846 = vmatprep.subr.bf16.mxu0 %v813_v20  ;;  %v402_v30 = vld [vmem:[%s1151_s3 + $0x58] sm:$0xff]  ;;  %v401_v34 = vld [vmem:[%s1151_s3 + $0x50] sm:$0xff] }
  0x1b   : > { %v819_v31 = vpack.c.bf16 %v397_v27, %v395_v26  ;;  %v821_v32 = vpack.c.bf16 %v402_v30, %v400_v29  ;;  %v399_v33 = vld [vmem:[%s1151_s3 + $0x40] sm:$0xff]  ;;  %v404_v35 = vld [vmem:[%s1151_s3 + $0x68] sm:$0xff]  ;;  %v406_v36 = vld [vmem:[%s1151_s3 + $0x78] sm:$0xff] }
  0x1c   : > { %816 = vmatpush1.bf16.msra.mxu1 %v815_v24  ;;  %802 = vmatmul.mubr.msk.f32.vlgmr.msra.gmra.mrb[0].mxu0 %vm313_vm0, %v302_v15  ;;  %v823_v37 = vpack.c.bf16 %v401_v34, %v399_v33  ;;  %v825_v38 = vpack.c.bf16 %v406_v36, %v404_v35  ;;  %v403_v39 = vld [vmem:[%s1151_s3 + $0x60] sm:$0xff]  ;;  %v405_v40 = vld [vmem:[%s1151_s3 + $0x70] sm:$0xff]  ;;  %v408_v41 = vld [vmem:[%s1151_s3 + $0x88] sm:$0xff] }
  0x1d   : > { %818 = vmatprep.subr.bf16.mxu1 %v817_v28  ;;  %848 = vmatpush1.bf16.msra.mxu0 %v815_v24  ;;  %v410_v42 = vld [vmem:[%s1151_s3 + $0x98] sm:$0xff]  ;;  %v827_v43 = vpack.c.bf16 %v405_v40, %v403_v39  ;;  %v407_v45 = vld [vmem:[%s1151_s3 + $0x80] sm:$0xff]  ;;  %v409_v46 = vld [vmem:[%s1151_s3 + $0x90] sm:$0xff] }
  0x1e   : > { %630 = vmatprep.mubr.f32.mxu0 %v933_v13  ;;  %850 = vmatprep.subr.bf16.mxu0 %v817_v28  ;;  %v829_v44 = vpack.c.bf16 %v410_v42, %v408_v41  ;;  %v412_v47 = vld [vmem:[%s1151_s3 + $0xa8] sm:$0xff]  ;;  %v414_v48 = vld [vmem:[%s1151_s3 + $0xb8] sm:$0xff]  ;;  %v831_v49 = vpack.c.bf16 %v409_v46, %v407_v45  ;;  %v411_v51 = vld [vmem:[%s1151_s3 + $0xa0] sm:$0xff] }
  0x1f   : > { %v833_v50 = vpack.c.bf16 %v414_v48, %v412_v47  ;;  %v413_v52 = vld [vmem:[%s1151_s3 + $0xb0] sm:$0xff]  ;;  %v416_v53 = vld [vmem:[%s1151_s3 + $0xc8] sm:$0xff]  ;;  %v418_v54 = vld [vmem:[%s1151_s3 + $0xd8] sm:$0xff] }
  0x20   : > { %820 = vmatpush1.bf16.msra.mxu1 %v819_v31  ;;  %v835_v55 = vpack.c.bf16 %v413_v52, %v411_v51  ;;  %v837_v56 = vpack.c.bf16 %v418_v54, %v416_v53  ;;  %v415_v57 = vld [vmem:[%s1151_s3 + $0xc0] sm:$0xff]  ;;  %v417_v58 = vld [vmem:[%s1151_s3 + $0xd0] sm:$0xff]  ;;  %v420_v59 = vld [vmem:[%s1151_s3 + $0xe8] sm:$0xff] }
  0x21   : > { %822 = vmatprep.subr.bf16.mxu1 %v821_v32  ;;  %852 = vmatpush1.bf16.msra.mxu0 %v819_v31  ;;  %v422_v60 = vld [vmem:[%s1151_s3 + $0xf8] sm:$0xff]  ;;  %v839_v61 = vpack.c.bf16 %v417_v58, %v415_v57  ;;  %v419_v63 = vld [vmem:[%s1151_s3 + $0xe0] sm:$0xff]  ;;  %v421_v0 = vld [vmem:[%s1151_s3 + $0xf0] sm:$0xff] }
  0x22   : > { %854 = vmatprep.subr.bf16.mxu0 %v821_v32  ;;  %v841_v62 = vpack.c.bf16 %v422_v60, %v420_v59  ;;  %v843_v1 = vpack.c.bf16 %v421_v0, %v419_v63 }
  0x24   : > { %824 = vmatpush1.bf16.msra.mxu1 %v823_v37 }
  0x25   : > { %826 = vmatprep.subr.bf16.mxu1 %v825_v38  ;;  %856 = vmatpush1.bf16.msra.mxu0 %v823_v37 }
  0x26   : > { %858 = vmatprep.subr.bf16.mxu0 %v825_v38 }
  0x28   : > { %828 = vmatpush1.bf16.msra.mxu1 %v827_v43 }
  0x29   : > { %830 = vmatprep.subr.bf16.mxu1 %v829_v44  ;;  %860 = vmatpush1.bf16.msra.mxu0 %v827_v43 }
  0x2a   : > { %862 = vmatprep.subr.bf16.mxu0 %v829_v44 }
  0x2c   : > { %832 = vmatpush1.bf16.msra.mxu1 %v831_v49 }
  0x2d   : > { %834 = vmatprep.subr.bf16.mxu1 %v833_v50  ;;  %864 = vmatpush1.bf16.msra.mxu0 %v831_v49 }
  0x2e   : > { %866 = vmatprep.subr.bf16.mxu0 %v833_v50 }
  0x30   : > { %836 = vmatpush1.bf16.msra.mxu1 %v835_v55 }
  0x31   : > { %838 = vmatprep.subr.bf16.mxu1 %v837_v56  ;;  %868 = vmatpush1.bf16.msra.mxu0 %v835_v55 }
  0x32   : > { %870 = vmatprep.subr.bf16.mxu0 %v837_v56 }
  0x34   : > { %840 = vmatpush1.bf16.msra.mxu1 %v839_v61 }
  0x35   : > { %842 = vmatprep.subr.bf16.mxu1 %v841_v62  ;;  %872 = vmatpush1.bf16.msra.mxu0 %v839_v61 }
  0x36   : > { %874 = vmatprep.subr.bf16.mxu0 %v841_v62 }
  0x38   : > { %844 = vmatpush1.bf16.msra.mxu1 %v843_v1 }
  0x39   : > { %876 = vmatpush1.bf16.msra.mxu0 %v843_v1 }
  0x98   : > { %v311_v2 = vpop.permute.xlu0 %310 }
  0xef   : > { %v383_v3 = vpop.f32.mrb[0].mxu0 }
  0xf0   : > { %v384_v4 = vadd.f32 %v383_v3, %v311_v2  ;;  %v385_v5 = vpop.f32.mrb[1].mxu0 }
  0xf1   : > { %v386_v6 = vadd.f32 %v385_v5, %v311_v2 }
  0xf2   : > { %488 = vmatmul.mubr.f32.vlgmr.msra.gmra.mrb[0].mxu1 %v384_v4 }
  0xf3   : > { %631 = vmatmul.mubr.f32.vlgmr.msra.gmra.mrb[2].mxu0 %v386_v6 }
 0x1c5   : > { %v489_v7 = vpop.f32.mrb[0].mxu1 }
 0x1c6   : > { %v632_v8 = vpop.f32.mrb[2].mxu0  ;;  %498 = vrot.lane.b32.xlu1 %v489_v7, %s935_s14  ;;  %495 = vrot.lane.b32.xlu0 %v489_v7, %s936_s15  ;;  %v491_v9 = vpop.f32.mrb[1].mxu1 }
 0x1c7   : > { %v634_v10 = vpop.f32.mrb[3].mxu0 }
 0x1ca   : > { %501 = vrot.lane.b32.xlu1 %v489_v7, %s937_s16  ;;  %505 = vrot.lane.b32.xlu0 %v491_v9, %s936_s15 }
 0x1ce   : > { %508 = vrot.lane.b32.xlu1 %v491_v9, %s935_s14  ;;  %511 = vrot.lane.b32.xlu0 %v491_v9, %s937_s16 }
 0x1d2   : > { %638 = vrot.lane.b32.xlu1 %v632_v8, %s936_s15  ;;  %641 = vrot.lane.b32.xlu0 %v632_v8, %s935_s14 }
 0x1d6   : > { %644 = vrot.lane.b32.xlu1 %v632_v8, %s937_s16  ;;  %648 = vrot.lane.b32.xlu0 %v634_v10, %s936_s15 }
 0x1da   : > { %651 = vrot.lane.b32.xlu1 %v634_v10, %s935_s14  ;;  %654 = vrot.lane.b32.xlu0 %v634_v10, %s937_s16 }
 0x238   : > { %v499_v11 = vpop.permute.xlu1 %498  ;;  %v496_v12 = vpop.permute.xlu0 %495 }
 0x239   : > { %v515_v13 = vsel %vm514_vm1, %v489_v7, %v496_v12 }
 0x23a   : > { %v517_v14 = vsel %vm516_vm2, %v515_v13, %v496_v12 }
 0x23b   : > { %v519_v15 = vsel %vm518_vm3, %v517_v14, %v499_v11 }
 0x23c   : > { %529 = vst [vmem:[%s995_s8] sm:$0xff] %v519_v15  ;;  %v502_v16 = vpop.permute.xlu1 %501  ;;  %v506_v17 = vpop.permute.xlu0 %505 }
 0x23d   : > { %v520_v18 = vsel %vm514_vm1, %v499_v11, %v502_v16  ;;  %v523_v19 = vsel %vm514_vm1, %v491_v9, %v506_v17 }
 0x23e   : > { %v521_v20 = vsel %vm516_vm2, %v520_v18, %v502_v16  ;;  %v524_v22 = vsel %vm516_vm2, %v523_v19, %v506_v17 }
 0x23f   : > { %v522_v21 = vsel %vm518_vm3, %v521_v20, %v489_v7 }
 0x240   : > { %530 = vst [vmem:[%s995_s8 + $0x8] sm:$0xff] %v522_v21  ;;  %v509_v23 = vpop.permute.xlu1 %508  ;;  %v512_v24 = vpop.permute.xlu0 %511 }
 0x241   : > { %v525_v25 = vsel %vm518_vm3, %v524_v22, %v509_v23  ;;  %v526_v26 = vsel %vm514_vm1, %v509_v23, %v512_v24 }
 0x242   : > { %531 = vst [vmem:[%s995_s8 + $0x10] sm:$0xff] %v525_v25  ;;  %v527_v27 = vsel %vm516_vm2, %v526_v26, %v512_v24 }
 0x243   : > { %v528_v28 = vsel %vm518_vm3, %v527_v27, %v491_v9 }
 0x244   : > { %532 = vst [vmem:[%s995_s8 + $0x18] sm:$0xff] %v528_v28  ;;  %v639_v29 = vpop.permute.xlu1 %638  ;;  %v642_v30 = vpop.permute.xlu0 %641 }
 0x245   : > { %v657_v31 = vsel %vm514_vm1, %v632_v8, %v639_v29 }
 0x246   : > { %v658_v32 = vsel %vm516_vm2, %v657_v31, %v639_v29 }
 0x247   : > { %v659_v33 = vsel %vm518_vm3, %v658_v32, %v642_v30 }
 0x248   : > { %669 = vst [vmem:[%s995_s8 + $0x20] sm:$0xff] %v659_v33  ;;  %v645_v34 = vpop.permute.xlu1 %644  ;;  %v649_v35 = vpop.permute.xlu0 %648 }
 0x249   : > { %v660_v36 = vsel %vm514_vm1, %v642_v30, %v645_v34  ;;  %v663_v37 = vsel %vm514_vm1, %v634_v10, %v649_v35 }
 0x24a   : > { %v661_v38 = vsel %vm516_vm2, %v660_v36, %v645_v34  ;;  %v664_v40 = vsel %vm516_vm2, %v663_v37, %v649_v35 }
 0x24b   : > { %v662_v39 = vsel %vm518_vm3, %v661_v38, %v632_v8 }
 0x24c   : > { %670 = vst [vmem:[%s995_s8 + $0x28] sm:$0xff] %v662_v39  ;;  %v652_v41 = vpop.permute.xlu1 %651  ;;  %v655_v42 = vpop.permute.xlu0 %654 }
 0x24d   : > { %v665_v43 = vsel %vm518_vm3, %v664_v40, %v652_v41  ;;  %v666_v44 = vsel %vm514_vm1, %v652_v41, %v655_v42 }
 0x24e   : > { %671 = vst [vmem:[%s995_s8 + $0x30] sm:$0xff] %v665_v43  ;;  %v667_v45 = vsel %vm516_vm2, %v666_v44, %v655_v42 }
 0x24f   : > { %v668_v46 = vsel %vm518_vm3, %v667_v45, %v634_v10 }
 0x250   : > { %672 = vst [vmem:[%s995_s8 + $0x38] sm:$0xff] %v668_v46 }
 0x251   : > { %919 = dma.done.wait [#allocation3], 1024 }
 0x252   : > { %920 = vsyncadd [#allocation3], 4294966272 }
 0x253 PF: > { %s15_s20 = sadd.s32 1, %s931_s20   ;;  %s1154_s18 = smov %s927_s19 }
 0x254   : > { %p12_p5 = scmp.ge.s32.totalorder %s15_s20, 4   ;;  %s1155_s19 = smov %s1157_s21 }
 0x256   :  { %14 = sbr.rel (!%p12_p5) target bundleno = 2 (0x2), region = 110 }
 0x25d   :  { %707 = vsyncmov [#allocation3] }
 0x260   :  { %s708_s17 = vpop.sfrf %707 }
 0x261   :  { %p805_p6 = scmp.ne.s32.totalorder %s708_s17, 0 }
 0x263   :  { %712 = shalt.err (%p805_p6)  }

</bundles_post_ra>
